<compile_context>
chip_gen: v5e
topology: v5e:2x2
jax: 0.10.0
libtpu: 0.0.40
codegen_flags: <defaults>
</compile_context>

<pallas_src>
import functools

import jax
import jax.numpy as jnp
from jax.experimental import pallas as pl
from jax.experimental.pallas import tpu as pltpu


def _round_up(x: int, m: int) -> int:
    return (x + m - 1) // m * m


def _supcon_kernel(*refs, n_rows: int, n_cols: int, inv_temp: float,
                   loss_scale: float, use_labels: bool,
                   rows_padded: bool, cols_padded: bool):
    if use_labels:
        (anchor_ref, contrastT_ref, rowlab_ref, collab_ref,
         out_ref, m_sc, l_sc, sps_sc, pc_sc) = refs
    else:
        (anchor_ref, contrastT_ref, mask_ref,
         out_ref, m_sc, l_sc, sps_sc, pc_sc) = refs

    i = pl.program_id(0)          # anchor-row block (parallel)
    j = pl.program_id(1)          # contrast-column block (online-softmax axis)

    @pl.when(j == 0)
    def _():
        m_sc[...] = jnp.full_like(m_sc, -1e30)
        l_sc[...] = jnp.zeros_like(l_sc)
        sps_sc[...] = jnp.zeros_like(sps_sc)
        pc_sc[...] = jnp.zeros_like(pc_sc)

    a = anchor_ref[...]                          # [tb, d_pad]  bf16
    ct = contrastT_ref[...]                      # [d_pad, tn]  bf16
    # bf16 x bf16 -> f32 accumulation on the MXU (full rate, no multi-pass).
    s = jnp.dot(a, ct, preferred_element_type=jnp.float32) * inv_temp
    tb, tn = s.shape

    col_ids = jax.lax.broadcasted_iota(jnp.int32, (tb, tn), 1) + j * tn
    row_ids = jax.lax.broadcasted_iota(jnp.int32, (tb, tn), 0) + i * tb
    not_diag = col_ids != row_ids                # drops the self-contrast column
    if cols_padded:
        col_valid = col_ids < n_cols
        logits_mask = jnp.logical_and(col_valid, not_diag)
        s_for_max = jnp.where(col_valid, s, jnp.float32(-1e30))
    else:                                        # statically skip padding mask
        logits_mask = not_diag
        s_for_max = s

    if use_labels:
        # Positive-pair mask rebuilt in-kernel from tiny label vectors.
        rl = jnp.broadcast_to(rowlab_ref[...], (tb, tn))
        cl = jnp.broadcast_to(collab_ref[...], (tb, tn))
        pos = jnp.where(jnp.logical_and(rl == cl, logits_mask), 1.0, 0.0)
    else:
        pos = mask_ref[...].astype(jnp.float32) * logits_mask.astype(jnp.float32)

    # Online softmax statistics (row max includes the diagonal, as in torch).
    m_prev = m_sc[...]
    m_new = jnp.maximum(m_prev, jnp.max(s_for_max, axis=1, keepdims=True))
    exp_l = jnp.where(logits_mask, jnp.exp(s - m_new), 0.0)
    l_sc[...] = l_sc[...] * jnp.exp(m_prev - m_new) + jnp.sum(exp_l, axis=1,
                                                              keepdims=True)
    sps_sc[...] += jnp.sum(pos * s, axis=1, keepdims=True)   # sum pos * logits_raw
    pc_sc[...] += jnp.sum(pos, axis=1, keepdims=True)        # positive count
    m_sc[...] = m_new

    @pl.when(j == pl.num_programs(1) - 1)
    def _():
        pc = pc_sc[...]
        pc_c = jnp.where(pc < 1e-6, 1.0, pc)
        log_denom = jnp.log(l_sc[...] + 1e-6)
        # sum(pos * (s - m - log_denom)) == sum(pos*s) - count*(m + log_denom)
        mean_lpp = (sps_sc[...] - pc * (m_sc[...] + log_denom)) / pc_c
        row_loss = loss_scale * mean_lpp                      # [tb, 1]
        if rows_padded:
            rids = jax.lax.broadcasted_iota(jnp.int32, (tb, 1), 0) + i * tb
            row_loss = jnp.where(rids < n_rows, row_loss, 0.0)
        bsum = jnp.sum(row_loss, axis=0, keepdims=True)       # [1, 1]
        # Lane-dense unmasked store: tile sums to this block's partial loss.
        out_ref[...] = jnp.broadcast_to(bsum * (1.0 / (8.0 * 128.0)), (8, 128))


def supcon_loss_pallas(features, labels=None, mask=None, *,
                       temperature: float = 0.07, contrast_mode: str = 'all',
                       base_temperature: float = 0.07):
    features = jnp.asarray(features)
    if features.ndim < 3:
        raise ValueError('`features` needs to be [bsz, n_views, ...], '
                         'at least 3 dimensions are required')
    bsz, n_views = features.shape[0], features.shape[1]
    feats = features.reshape(bsz, n_views, -1).astype(jnp.float32)
    d = feats.shape[-1]

    if labels is not None and mask is not None:
        raise ValueError('Cannot define both `labels` and `mask`')
    use_labels = mask is None
    if use_labels:
        if labels is None:
            lab_vec = jnp.arange(bsz, dtype=jnp.int32)       # SimCLR: eye mask
        else:
            lab_vec = jnp.asarray(labels).reshape(-1).astype(jnp.int32)
            if lab_vec.shape[0] != bsz:
                raise ValueError('Num of labels does not match num of features')
    else:
        base_mask = jnp.asarray(mask, dtype=jnp.float32)

    # contrast_feature = torch.cat(torch.unbind(features, dim=1), dim=0)
    contrast = jnp.swapaxes(feats, 0, 1).reshape(n_views * bsz, d)
    if contrast_mode == 'one':
        anchor, anchor_count = feats[:, 0, :], 1
    elif contrast_mode == 'all':
        anchor, anchor_count = contrast, n_views
    else:
        raise ValueError('Unknown mode: {}'.format(contrast_mode))

    n_rows = anchor_count * bsz       # anchor rows
    n_cols = n_views * bsz            # contrast columns
    d_pad = _round_up(d, 128)         # lane-aligned MXU contraction dim

    # ---- generation-aware VMEM budget (v5e/v6e 128 MiB, v7x 64 MiB/TC) ----
    try:
        vmem_cap = int(pltpu.get_tpu_info().vmem_capacity_bytes)
        vmem_limit = (vmem_cap * 3) // 4
    except Exception:                                    # pragma: no cover
        vmem_limit = 32 << 20
    budget = int(vmem_limit * 0.7)

    tb = min(256, _round_up(n_rows, 8))                  # MXU-height row tile
    tn_full = _round_up(n_cols, 128)

    def working_bytes(tb_, tn_):
        anchor_b = 2 * tb_ * d_pad * 2                   # bf16, double-buffered
        ct_b = 2 * d_pad * tn_ * 2                       # bf16, double-buffered
        side_b = (2 * (tb_ + tn_) * 4) if use_labels else (2 * tb_ * tn_ * 2)
        inter_b = 6 * tb_ * tn_ * 4                      # f32 elementwise temps
        scr_b = 4 * tb_ * 4 + 2 * 8 * 128 * 4
        return anchor_b + ct_b + side_b + inter_b + scr_b

    # Column-tile (online softmax) before ever shrinking the row tile, and
    # never shrink the row tile below 128 (keeps MXU tiles efficient).
    tn = tn_full
    while tn > 512 and working_bytes(tb, tn) > budget:
        tn = _round_up(max(512, tn // 2), 128)
    while tb > 128 and working_bytes(tb, tn) > budget:
        tb = _round_up(max(128, tb // 2), 8)

    m_pad = _round_up(n_rows, tb)
    n_pad = _round_up(n_cols, tn)
    n_row_blocks = m_pad // tb
    n_col_blocks = n_pad // tn

    anchor_p = jnp.pad(anchor.astype(jnp.bfloat16),
                       ((0, m_pad - n_rows), (0, d_pad - d)))
    contrastT_p = jnp.pad(contrast.T.astype(jnp.bfloat16),
                          ((0, d_pad - d), (0, n_pad - n_cols)))

    in_specs = [pl.BlockSpec((tb, d_pad), lambda i, j: (i, 0)),   # anchor rows
                pl.BlockSpec((d_pad, tn), lambda i, j: (0, j))]   # contrast^T cols
    if use_labels:
        row_lab = jnp.pad(jnp.tile(lab_vec, anchor_count),
                          (0, m_pad - n_rows), constant_values=-1)
        col_lab = jnp.pad(jnp.tile(lab_vec, n_views),
                          (0, n_pad - n_cols), constant_values=-1)
        operands = (anchor_p, contrastT_p,
                    row_lab.reshape(m_pad, 1), col_lab.reshape(1, n_pad))
        in_specs += [pl.BlockSpec((tb, 1), lambda i, j: (i, 0)),
                     pl.BlockSpec((1, tn), lambda i, j: (0, j))]
    else:
        # TODO(synk): the explicit-mask fallback still streams an O(N^2) mask
        # (bf16 = half of f32 bandwidth); the labels/SimCLR path avoids it.
        full_mask = jnp.tile(base_mask, (anchor_count, n_views)).astype(jnp.bfloat16)
        mask_p = jnp.pad(full_mask, ((0, m_pad - n_rows), (0, n_pad - n_cols)))
        operands = (anchor_p, contrastT_p, mask_p)
        in_specs += [pl.BlockSpec((tb, tn), lambda i, j: (i, j))]

    kernel = functools.partial(
        _supcon_kernel,
        n_rows=n_rows, n_cols=n_cols,
        inv_temp=float(1.0 / temperature),
        loss_scale=float(-(temperature / base_temperature)),
        use_labels=use_labels,
        rows_padded=(m_pad != n_rows),
        cols_padded=(n_pad != n_cols))

    out = pl.pallas_call(
        kernel,
        out_shape=jax.ShapeDtypeStruct((n_row_blocks * 8, 128), jnp.float32),
        grid_spec=pltpu.PrefetchScalarGridSpec(
            num_scalar_prefetch=0,
            grid=(n_row_blocks, n_col_blocks),
            in_specs=in_specs,
            out_specs=pl.BlockSpec((8, 128), lambda i, j: (i, 0)),
            scratch_shapes=[pltpu.VMEM((tb, 1), jnp.float32)] * 4,
        ),
        compiler_params=pltpu.CompilerParams(
            dimension_semantics=("parallel", "arbitrary"),
            vmem_limit_bytes=vmem_limit),
    )(*operands)
    # Each (8,128) block tile sums to that block's partial loss sum.
    return jnp.sum(out) / jnp.float32(n_rows)


def _supcon_ref(features, labels=None, mask=None, *, temperature=0.07,
                contrast_mode='all', base_temperature=0.07,
                matmul_dtype=jnp.float32):
    """Pure-JAX mirror of the PyTorch SupConLoss.forward (for verification)."""
    bsz, n_views = features.shape[0], features.shape[1]
    feats = features.reshape(bsz, n_views, -1).astype(jnp.float32)
    if labels is None and mask is None:
        mask = jnp.eye(bsz, dtype=jnp.float32)
    elif labels is not None:
        lab = jnp.asarray(labels).reshape(-1, 1)
        mask = (lab == lab.T).astype(jnp.float32)
    else:
        mask = jnp.asarray(mask, dtype=jnp.float32)
    contrast_count = n_views
    contrast_feature = jnp.swapaxes(feats, 0, 1).reshape(n_views * bsz, -1)
    if contrast_mode == 'one':
        anchor_feature, anchor_count = feats[:, 0], 1
    else:
        anchor_feature, anchor_count = contrast_feature, contrast_count
    prec = jax.lax.Precision.HIGHEST if matmul_dtype == jnp.float32 else None
    adc = jnp.dot(anchor_feature.astype(matmul_dtype),
                  contrast_feature.astype(matmul_dtype).T,
                  preferred_element_type=jnp.float32,
                  precision=prec) / temperature
    logits = adc - jnp.max(adc, axis=1, keepdims=True)
    mask = jnp.tile(mask, (anchor_count, contrast_count))
    n_anchor = bsz * anchor_count
    logits_mask = 1.0 - jnp.eye(n_anchor, mask.shape[1], dtype=jnp.float32)
    mask = mask * logits_mask
    exp_logits = jnp.exp(logits) * logits_mask
    log_prob = logits - jnp.log(jnp.sum(exp_logits, axis=1, keepdims=True) + 1e-6)
    mask_pos_pairs = jnp.sum(mask, axis=1)
    mask_pos_pairs = jnp.where(mask_pos_pairs < 1e-6, 1.0, mask_pos_pairs)
    mean_log_prob_pos = jnp.sum(mask * log_prob, axis=1) / mask_pos_pairs
    loss = -(temperature / base_temperature) * mean_log_prob_pos
    return jnp.mean(loss.reshape(anchor_count, bsz))


if __name__ == "__main__":
    key = jax.random.PRNGKey(0)
    k1, k2, k3 = jax.random.split(key, 3)

    # features: [bsz, n_views, hidden], L2-normalized as is typical for SupCon
    bsz, n_views, hidden = 8, 2, 32
    feats = jax.random.normal(k1, (bsz, n_views, hidden), jnp.float32)
    feats = feats / jnp.linalg.norm(feats, axis=-1, keepdims=True)
    labels = jax.random.randint(k2, (bsz,), 0, 4)
    user_mask = jnp.maximum(
        (jax.random.uniform(k3, (bsz, bsz)) > 0.5).astype(jnp.float32),
        jnp.eye(bsz, dtype=jnp.float32))

    cases = [
        ("simclr", {}),
        ("supervised", {"labels": labels}),
        ("mode_one", {"labels": labels, "contrast_mode": "one"}),
        ("explicit_mask", {"mask": user_mask}),
    ]
    for name, kw in cases:
        got = supcon_loss_pallas(feats, **kw)
        jax.block_until_ready(got)
        # Tight check vs a reference that uses the same bf16 similarity matmul.
        want_bf16 = _supcon_ref(feats, matmul_dtype=jnp.bfloat16, **kw)
        assert jnp.allclose(got, want_bf16, rtol=5e-3, atol=5e-3), (
            name, got, want_bf16)
        # Loose sanity check vs the full-f32 (PyTorch-equivalent) reference.
        want_f32 = _supcon_ref(feats, **kw)
        assert jnp.allclose(got, want_f32, rtol=1e-1, atol=2e-1), (
            name, got, want_f32)
    print("KERNEL_OK")
</pallas_src>

<mosaic_0001>
module attributes {stable_mosaic.version = 11 : i64} {
  func.func @_supcon_kernel(%arg0: i32, %arg1: i32, %arg2: memref<16x128xbf16, #tpu.memory_space<vmem>>, %arg3: memref<128x128xbf16, #tpu.memory_space<vmem>>, %arg4: memref<16x1xi32, #tpu.memory_space<vmem>>, %arg5: memref<1x128xi32, #tpu.memory_space<vmem>>, %arg6: memref<8x128xf32, #tpu.memory_space<vmem>>, %arg7: memref<16x1xf32, #tpu.memory_space<vmem>>, %arg8: memref<16x1xf32, #tpu.memory_space<vmem>>, %arg9: memref<16x1xf32, #tpu.memory_space<vmem>>, %arg10: memref<16x1xf32, #tpu.memory_space<vmem>>) attributes {dimension_semantics = [#tpu.dimension_semantics<parallel>, #tpu.dimension_semantics<arbitrary>], iteration_bounds = array<i64: 1, 1>, scalar_prefetch = 0 : i64, scratch_operands = 4 : i64, tpu.core_type = #tpu.core_type<tc>, window_params = [{transform_indices = @transform_0, window_bounds = array<i64: 16, 128>}, {transform_indices = @transform_1, window_bounds = array<i64: 128, 128>}, {transform_indices = @transform_2, window_bounds = array<i64: 16, 1>}, {transform_indices = @transform_3, window_bounds = array<i64: 1, 128>}, {transform_indices = @transform_4, window_bounds = array<i64: 8, 128>}]} {
    %c0_i32 = arith.constant 0 : i32
    %0 = arith.cmpi eq, %arg1, %c0_i32 : i32
    %1 = arith.extui %0 : i1 to i32
    %c0_i32_0 = arith.constant 0 : i32
    %2 = arith.cmpi ne, %1, %c0_i32_0 : i32
    scf.if %2 {
      %cst_36 = arith.constant -1.000000e+30 : f32
      %65 = vector.broadcast %cst_36 : f32 to vector<16x1xf32>
      %c0_37 = arith.constant 0 : index
      %c0_38 = arith.constant 0 : index
      %66 = vector.load %arg7[%c0_37, %c0_38] : memref<16x1xf32, #tpu.memory_space<vmem>>, vector<16x1xf32>
      tpu.vector_store %arg7[%c0_37, %c0_38], %65 {strides = array<i32>} : memref<16x1xf32, #tpu.memory_space<vmem>>, vector<16x1xf32>,
      %cst_39 = arith.constant 0.000000e+00 : f32
      %67 = vector.broadcast %cst_39 : f32 to vector<16x1xf32>
      %c0_40 = arith.constant 0 : index
      %c0_41 = arith.constant 0 : index
      %68 = vector.load %arg8[%c0_40, %c0_41] : memref<16x1xf32, #tpu.memory_space<vmem>>, vector<16x1xf32>
      tpu.vector_store %arg8[%c0_40, %c0_41], %67 {strides = array<i32>} : memref<16x1xf32, #tpu.memory_space<vmem>>, vector<16x1xf32>,
      %cst_42 = arith.constant 0.000000e+00 : f32
      %69 = vector.broadcast %cst_42 : f32 to vector<16x1xf32>
      %c0_43 = arith.constant 0 : index
      %c0_44 = arith.constant 0 : index
      %70 = vector.load %arg9[%c0_43, %c0_44] : memref<16x1xf32, #tpu.memory_space<vmem>>, vector<16x1xf32>
      tpu.vector_store %arg9[%c0_43, %c0_44], %69 {strides = array<i32>} : memref<16x1xf32, #tpu.memory_space<vmem>>, vector<16x1xf32>,
      %cst_45 = arith.constant 0.000000e+00 : f32
      %71 = vector.broadcast %cst_45 : f32 to vector<16x1xf32>
      %c0_46 = arith.constant 0 : index
      %c0_47 = arith.constant 0 : index
      %72 = vector.load %arg10[%c0_46, %c0_47] : memref<16x1xf32, #tpu.memory_space<vmem>>, vector<16x1xf32>
      tpu.vector_store %arg10[%c0_46, %c0_47], %71 {strides = array<i32>} : memref<16x1xf32, #tpu.memory_space<vmem>>, vector<16x1xf32>,
    } else {
    }
    %c0 = arith.constant 0 : index
    %c0_1 = arith.constant 0 : index
    %3 = vector.load %arg2[%c0, %c0_1] : memref<16x128xbf16, #tpu.memory_space<vmem>>, vector<16x128xbf16>
    %c0_2 = arith.constant 0 : index
    %c0_3 = arith.constant 0 : index
    %4 = vector.load %arg3[%c0_2, %c0_3] : memref<128x128xbf16, #tpu.memory_space<vmem>>, vector<128x128xbf16>
    %cst = arith.constant dense<0.000000e+00> : vector<16x128xf32>
    %5 = tpu.matmul %3, %4, %cst {dimension_numbers = #tpu.dot_dimension_numbers<[1], [0], [0], [1], [0, 0, 1, 1], [], []>} : vector<16x128xbf16>, vector<128x128xbf16>, vector<16x128xf32> -> vector<16x128xf32>
    %cst_4 = arith.constant 14.2857141 : f32
    %6 = vector.broadcast %cst_4 : f32 to vector<16x128xf32>
    %7 = arith.mulf %5, %6 : vector<16x128xf32>
    %8 = tpu.iota {dimensions = array<i32: 1>} : vector<16x128xi32>
    %c128_i32 = arith.constant 128 : i32
    %9 = arith.muli %arg1, %c128_i32 : i32
    %10 = vector.broadcast %9 : i32 to vector<16x128xi32>
    %11 = arith.addi %8, %10 : vector<16x128xi32>
    %12 = tpu.iota {dimensions = array<i32: 0>} : vector<16x128xi32>
    %c16_i32 = arith.constant 16 : i32
    %13 = arith.muli %arg0, %c16_i32 : i32
    %14 = vector.broadcast %13 : i32 to vector<16x128xi32>
    %15 = arith.addi %12, %14 : vector<16x128xi32>
    %16 = arith.cmpi ne, %11, %15 : vector<16x128xi32>
    %c16_i32_5 = arith.constant 16 : i32
    %17 = vector.broadcast %c16_i32_5 : i32 to vector<16x128xi32>
    %18 = arith.cmpi slt, %11, %17 : vector<16x128xi32>
    %19 = arith.andi %18, %16 : vector<16x128xi1>
    %cst_6 = arith.constant -1.000000e+30 : f32
    %20 = vector.broadcast %cst_6 : f32 to vector<16x128xf32>
    %21 = arith.select %18, %7, %20 : vector<16x128xi1>, vector<16x128xf32>
    %c0_7 = arith.constant 0 : index
    %c0_8 = arith.constant 0 : index
    %22 = vector.load %arg4[%c0_7, %c0_8] : memref<16x1xi32, #tpu.memory_space<vmem>>, vector<16x1xi32>
    %23 = vector.shape_cast %22 : vector<16x1xi32> to vector<16x1xi32>
    %24 = vector.broadcast %23 : vector<16x1xi32> to vector<16x128xi32>
    %c0_9 = arith.constant 0 : index
    %c0_10 = arith.constant 0 : index
    %25 = vector.load %arg5[%c0_9, %c0_10] : memref<1x128xi32, #tpu.memory_space<vmem>>, vector<1x128xi32>
    %26 = vector.shape_cast %25 : vector<1x128xi32> to vector<1x128xi32>
    %27 = vector.broadcast %26 : vector<1x128xi32> to vector<16x128xi32>
    %28 = arith.cmpi eq, %24, %27 : vector<16x128xi32>
    %29 = arith.andi %28, %19 : vector<16x128xi1>
    %cst_11 = arith.constant 1.000000e+00 : f32
    %cst_12 = arith.constant 0.000000e+00 : f32
    %30 = vector.broadcast %cst_11 : f32 to vector<16x128xf32>
    %31 = vector.broadcast %cst_12 : f32 to vector<16x128xf32>
    %32 = arith.select %29, %30, %31 : vector<16x128xi1>, vector<16x128xf32>
    %c0_13 = arith.constant 0 : index
    %c0_14 = arith.constant 0 : index
    %33 = vector.load %arg7[%c0_13, %c0_14] : memref<16x1xf32, #tpu.memory_space<vmem>>, vector<16x1xf32>
    %cst_15 = arith.constant dense<0xFF800000> : vector<16xf32>
    %34 = vector.multi_reduction <maximumf>, %21, %cst_15 [1] : vector<16x128xf32> to vector<16xf32>
    %35 = vector.shape_cast %34 : vector<16xf32> to vector<16x1xf32>
    %36 = arith.maximumf %33, %35 : vector<16x1xf32>
    %37 = vector.broadcast %36 : vector<16x1xf32> to vector<16x128xf32>
    %38 = arith.subf %7, %37 : vector<16x128xf32>
    %39 = math.exp %38 : vector<16x128xf32>
    %cst_16 = arith.constant 0.000000e+00 : f32
    %40 = vector.broadcast %cst_16 : f32 to vector<16x128xf32>
    %41 = arith.select %19, %39, %40 : vector<16x128xi1>, vector<16x128xf32>
    %c0_17 = arith.constant 0 : index
    %c0_18 = arith.constant 0 : index
    %42 = vector.load %arg8[%c0_17, %c0_18] : memref<16x1xf32, #tpu.memory_space<vmem>>, vector<16x1xf32>
    %43 = arith.subf %33, %36 : vector<16x1xf32>
    %44 = math.exp %43 : vector<16x1xf32>
    %45 = arith.mulf %42, %44 : vector<16x1xf32>
    %cst_19 = arith.constant dense<0.000000e+00> : vector<16xf32>
    %46 = vector.multi_reduction <add>, %41, %cst_19 [1] : vector<16x128xf32> to vector<16xf32>
    %47 = vector.shape_cast %46 : vector<16xf32> to vector<16x1xf32>
    %48 = arith.addf %45, %47 : vector<16x1xf32>
    %c0_20 = arith.constant 0 : index
    %c0_21 = arith.constant 0 : index
    %49 = vector.load %arg8[%c0_20, %c0_21] : memref<16x1xf32, #tpu.memory_space<vmem>>, vector<16x1xf32>
    tpu.vector_store %arg8[%c0_20, %c0_21], %48 {strides = array<i32>} : memref<16x1xf32, #tpu.memory_space<vmem>>, vector<16x1xf32>,
    %c0_22 = arith.constant 0 : index
    %c0_23 = arith.constant 0 : index
    %50 = vector.load %arg9[%c0_22, %c0_23] : memref<16x1xf32, #tpu.memory_space<vmem>>, vector<16x1xf32>
    %51 = arith.mulf %32, %7 : vector<16x128xf32>
    %cst_24 = arith.constant dense<0.000000e+00> : vector<16xf32>
    %52 = vector.multi_reduction <add>, %51, %cst_24 [1] : vector<16x128xf32> to vector<16xf32>
    %53 = vector.shape_cast %52 : vector<16xf32> to vector<16x1xf32>
    %54 = arith.addf %50, %53 : vector<16x1xf32>
    %c0_25 = arith.constant 0 : index
    %c0_26 = arith.constant 0 : index
    %55 = vector.load %arg9[%c0_25, %c0_26] : memref<16x1xf32, #tpu.memory_space<vmem>>, vector<16x1xf32>
    tpu.vector_store %arg9[%c0_25, %c0_26], %54 {strides = array<i32>} : memref<16x1xf32, #tpu.memory_space<vmem>>, vector<16x1xf32>,
    %c0_27 = arith.constant 0 : index
    %c0_28 = arith.constant 0 : index
    %56 = vector.load %arg10[%c0_27, %c0_28] : memref<16x1xf32, #tpu.memory_space<vmem>>, vector<16x1xf32>
    %cst_29 = arith.constant dense<0.000000e+00> : vector<16xf32>
    %57 = vector.multi_reduction <add>, %32, %cst_29 [1] : vector<16x128xf32> to vector<16xf32>
    %58 = vector.shape_cast %57 : vector<16xf32> to vector<16x1xf32>
    %59 = arith.addf %56, %58 : vector<16x1xf32>
    %c0_30 = arith.constant 0 : index
    %c0_31 = arith.constant 0 : index
    %60 = vector.load %arg10[%c0_30, %c0_31] : memref<16x1xf32, #tpu.memory_space<vmem>>, vector<16x1xf32>
    tpu.vector_store %arg10[%c0_30, %c0_31], %59 {strides = array<i32>} : memref<16x1xf32, #tpu.memory_space<vmem>>, vector<16x1xf32>,
    %c0_32 = arith.constant 0 : index
    %c0_33 = arith.constant 0 : index
    %61 = vector.load %arg7[%c0_32, %c0_33] : memref<16x1xf32, #tpu.memory_space<vmem>>, vector<16x1xf32>
    tpu.vector_store %arg7[%c0_32, %c0_33], %36 {strides = array<i32>} : memref<16x1xf32, #tpu.memory_space<vmem>>, vector<16x1xf32>,
    %c0_i32_34 = arith.constant 0 : i32
    %62 = arith.cmpi eq, %arg1, %c0_i32_34 : i32
    %63 = arith.extui %62 : i1 to i32
    %c0_i32_35 = arith.constant 0 : i32
    %64 = arith.cmpi ne, %63, %c0_i32_35 : i32
    scf.if %64 {
      %c0_36 = arith.constant 0 : index
      %c0_37 = arith.constant 0 : index
      %65 = vector.load %arg10[%c0_36, %c0_37] : memref<16x1xf32, #tpu.memory_space<vmem>>, vector<16x1xf32>
      %cst_38 = arith.constant 9.99999997E-7 : f32
      %66 = vector.broadcast %cst_38 : f32 to vector<16x1xf32>
      %67 = arith.cmpf olt, %65, %66 : vector<16x1xf32>
      %cst_39 = arith.constant 1.000000e+00 : f32
      %68 = vector.broadcast %cst_39 : f32 to vector<16x1xf32>
      %69 = arith.select %67, %68, %65 : vector<16x1xi1>, vector<16x1xf32>
      %c0_40 = arith.constant 0 : index
      %c0_41 = arith.constant 0 : index
      %70 = vector.load %arg8[%c0_40, %c0_41] : memref<16x1xf32, #tpu.memory_space<vmem>>, vector<16x1xf32>
      %cst_42 = arith.constant 9.99999997E-7 : f32
      %71 = vector.broadcast %cst_42 : f32 to vector<16x1xf32>
      %72 = arith.addf %70, %71 : vector<16x1xf32>
      %73 = math.log %72 : vector<16x1xf32>
      %c0_43 = arith.constant 0 : index
      %c0_44 = arith.constant 0 : index
      %74 = vector.load %arg9[%c0_43, %c0_44] : memref<16x1xf32, #tpu.memory_space<vmem>>, vector<16x1xf32>
      %c0_45 = arith.constant 0 : index
      %c0_46 = arith.constant 0 : index
      %75 = vector.load %arg7[%c0_45, %c0_46] : memref<16x1xf32, #tpu.memory_space<vmem>>, vector<16x1xf32>
      %76 = arith.addf %75, %73 : vector<16x1xf32>
      %77 = arith.mulf %65, %76 : vector<16x1xf32>
      %78 = arith.subf %74, %77 : vector<16x1xf32>
      %79 = arith.divf %78, %69 : vector<16x1xf32>
      %cst_47 = arith.constant -1.000000e+00 : f32
      %80 = vector.broadcast %cst_47 : f32 to vector<16x1xf32>
      %81 = arith.mulf %80, %79 : vector<16x1xf32>
      %cst_48 = arith.constant dense<0.000000e+00> : vector<1xf32>
      %82 = vector.multi_reduction <add>, %81, %cst_48 [0] : vector<16x1xf32> to vector<1xf32>
      %83 = vector.shape_cast %82 : vector<1xf32> to vector<1x1xf32>
      %cst_49 = arith.constant 9.765625E-4 : f32
      %84 = vector.broadcast %cst_49 : f32 to vector<1x1xf32>
      %85 = arith.mulf %83, %84 : vector<1x1xf32>
      %86 = vector.shape_cast %85 : vector<1x1xf32> to vector<1x1xf32>
      %87 = vector.broadcast %86 : vector<1x1xf32> to vector<8x128xf32>
      %c0_50 = arith.constant 0 : index
      %c0_51 = arith.constant 0 : index
      %88 = vector.load %arg6[%c0_50, %c0_51] : memref<8x128xf32, #tpu.memory_space<vmem>>, vector<8x128xf32>
      tpu.vector_store %arg6[%c0_50, %c0_51], %87 {strides = array<i32>} : memref<8x128xf32, #tpu.memory_space<vmem>>, vector<8x128xf32>,
    } else {
    }
    return
  }
  func.func @transform_0(%arg0: i32, %arg1: i32) -> (i32, i32) {
    %c0_i32 = arith.constant 0 : i32
    %c0_i32_0 = arith.constant 0 : i32
    return %arg0, %c0_i32 : i32, i32
  }
  func.func @transform_1(%arg0: i32, %arg1: i32) -> (i32, i32) {
    %c0_i32 = arith.constant 0 : i32
    %c0_i32_0 = arith.constant 0 : i32
    return %c0_i32, %arg1 : i32, i32
  }
  func.func @transform_2(%arg0: i32, %arg1: i32) -> (i32, i32) {
    %c0_i32 = arith.constant 0 : i32
    %c0_i32_0 = arith.constant 0 : i32
    return %arg0, %c0_i32 : i32, i32
  }
  func.func @transform_3(%arg0: i32, %arg1: i32) -> (i32, i32) {
    %c0_i32 = arith.constant 0 : i32
    %c0_i32_0 = arith.constant 0 : i32
    return %c0_i32, %arg1 : i32, i32
  }
  func.func @transform_4(%arg0: i32, %arg1: i32) -> (i32, i32) {
    %c0_i32 = arith.constant 0 : i32
    %c0_i32_0 = arith.constant 0 : i32
    return %arg0, %c0_i32 : i32, i32
  }
}

</mosaic_0001>

<bundles_post_ra>
// kernel: tpu_custom_call.1
= control target key start
LH: loop header
LB: loop body
LE: loop exit
PB: predicated region body
PF: predicated region fallthrough
CT: control target
= control target key end

     0   :  { %9 = vsyncpa [#allocation7], 0  ;;  %s554_s0 = inlined_call_operand.vmem [shape: bf16[16,128], index: 0, kind: input, shape index: {}]   ;;  %s555_s1 = inlined_call_operand.hbm [shape: bf16[128,128], index: 1, kind: input, shape index: {}]   ;;  %s556_s2 = inlined_call_operand.vmem [shape: s32[16,1], index: 2, kind: input, shape index: {}]   ;;  %s557_s3 = inlined_call_operand.vmem [shape: s32[1,128], index: 3, kind: input, shape index: {}]   ;;  %s558_s4 = inlined_call_operand.hbm [shape: f32[8,128], index: 4, kind: output, shape index: {}]  }
   0x1   :  { %10 = vsyncpa [#allocation8], 0  ;;  %s17_s17 = sshll.u32 %s555_s1, 4  ;;  %s455_s18 = smov [#allocation6]   ;;  %s18_s17 = int_to_ptr.hbm [resolvable:$true] %s17_s17 }
   0x2   :  { %s19_s19 = sshll.u32 %s455_s18, 4  ;;  %s456_s20 = smov 64   ;;  %s20_s19 = int_to_ptr.vmem [resolvable:$true] %s19_s19 }
   0x3   :  { %s457_s21 = smov 4  }
   0x4   :  { %25 = dma.hbm_to_vmem [thread:$0]  %s18_s17, 1024, %s20_s19, [#allocation7], %s456_s20, %s456_s20, %s457_s21  }
   0x5   :  { %451 = dma.done.wait [#allocation7], 1024  }
   0x6   :  { %452 = vsyncadd [#allocation7], 4294966272  ;;  %v375_v0 = vld [vmem:[#allocation6 + $0x38] sm:$0xff]  ;;  %v374_v1 = vld [vmem:[#allocation6 + $0x30] sm:$0xff]  ;;  %v458_v2 = vmov 0   ;;  %v135_v13 = vlaneseq  ;;  %v459_v20 = vmov 0.0  }
   0x7   :  { %119 = vmatpush.bf16.msra.mxu0 %v375_v0  ;;  %384 = vset.pattern.permute.xlu2 %v458_v2  ;;  %v154_v3 = vld [vmem:[%s556_s2] sm:$0xff]  ;;  %v373_v4 = vld [vmem:[#allocation6 + $0x28] sm:$0xff]  ;;  %v371_v7 = vld [vmem:[#allocation6 + $0x18] sm:$0xff]  ;;  %vm38_vm5 = vcmask 7168   ;;  %v460_v22 = vmov -1e+30  }
   0x8   :  { %383 = vset.pattern.permute.xlu1 %v458_v2  ;;  %385 = vset.pattern.permute.xlu0 %v458_v2  ;;  %v155_v5 = vld [vmem:[%s556_s2 + $0x8] sm:$0xff]  ;;  %v372_v6 = vld [vmem:[#allocation6 + $0x20] sm:$0xff]  ;;  %v370_v8 = vld [vmem:[#allocation6 + $0x10] sm:$0xff]  ;;  %v136_v14 = vand.u32 127, %v135_v13  ;;  %v141_v15 = vshrl.u32 %v135_v13, 7  ;;  %39 = vst.msk [vmem:[#allocation2] sm:$0xff] %vm38_vm5, %v460_v22 }
   0x9   :  { %157 = vperm.xlu2 %384, %v154_v3   ;;  %v369_v9 = vld [vmem:[#allocation6 + $0x8] sm:$0xff]  ;;  %v368_v10 = vld [vmem:[#allocation6] sm:$0xff]  ;;  %40 = vst.msk [vmem:[#allocation2 + $0x8] sm:$0xff] %vm38_vm5, %v460_v22  ;;  %s321_s30 = sshll.u32 %s558_s4, 4  ;;  %s322_s30 = int_to_ptr.hbm [resolvable:$true] %s321_s30 }
   0xa   :  { %v367_v11 = vld [vmem:[%s554_s0] sm:$0xff]  ;;  %v142_v18 = vadd.s32 8, %v141_v15  ;;  %vm149_vm1 = vcmp.lt.s32.totalorder %v136_v14, 16  ;;  %41 = vst.msk [vmem:[#allocation3] sm:$0xff] %vm38_vm5, %v459_v20  ;;  %vm147_vm6 = vcmp.ne.s32.totalorder %v136_v14, %v141_v15  ;;  %s461_s0 = smov [#allocation9]  }
   0xb   :  { %120 = vmatpush.bf16.msra.mxu0 %v374_v1  ;;  %v386_v16 = vld [vmem:[%s557_s3] ss:$0 sm:$0xff]  ;;  %42 = vst.msk [vmem:[#allocation3 + $0x8] sm:$0xff] %vm38_vm5, %v459_v20  ;;  %vm520_vm8 = vmand %vm149_vm1, %vm147_vm6  ;;  %s319_s3 = sshll.u32 %s461_s0, 4  ;;  %s320_s3 = int_to_ptr.vmem [resolvable:$true] %s319_s3 }
   0xc   :  { %vm148_vm2 = vcmp.ne.s32.totalorder %v136_v14, %v142_v18  ;;  %43 = vst.msk [vmem:[#allocation4] sm:$0xff] %vm38_vm5, %v459_v20 }
   0xd   :  { %vm503_vm3 = vmand %vm149_vm1, %vm148_vm2  ;;  %44 = vst.msk [vmem:[#allocation4 + $0x8] sm:$0xff] %vm38_vm5, %v459_v20 }
   0xe   :  { %45 = vst.msk [vmem:[#allocation5] sm:$0xff] %vm38_vm5, %v459_v20 }
   0xf   :  { %121 = vmatpush.bf16.msra.mxu0 %v373_v4  ;;  %46 = vst.msk [vmem:[#allocation5 + $0x8] sm:$0xff] %vm38_vm5, %v459_v20  ;;  %v170_v31 = vld [vmem:[#allocation2] sm:$0xff] }
  0x10   :  { %v171_v35 = vld [vmem:[#allocation2 + $0x8] sm:$0xff] }
  0x11   :  { %160 = vperm.xlu2 %384, %v155_v5   ;;  %v196_v61 = vld [vmem:[#allocation3] sm:$0xff] }
  0x12   :  { %v197_v4 = vld [vmem:[#allocation3 + $0x8] sm:$0xff] }
  0x13   :  { %122 = vmatpush.bf16.msra.mxu0 %v372_v6  ;;  %v215_v14 = vld [vmem:[#allocation4] sm:$0xff] }
  0x15   :  { %v227_v43 = vld [vmem:[#allocation5] sm:$0xff] }
  0x16   :  { %v228_v54 = vld [vmem:[#allocation5 + $0x8] sm:$0xff] }
  0x17   :  { %123 = vmatpush.bf16.msra.mxu0 %v371_v7 }
  0x1b   :  { %124 = vmatpush.bf16.msra.mxu0 %v370_v8 }
  0x1f   :  { %125 = vmatpush.bf16.msra.mxu0 %v369_v9 }
  0x23   :  { %126 = vmatpush.bf16.msra.mxu0 %v368_v10 }
  0x26   :  { %127 = vmatmul.bf16.vlgmr.msra.gmra.mxu0 %v367_v11 }
  0x63   :  { %v158_v12 = vpop.permute.xlu2 %157 }
  0x64   :  { %vm164_vm7 = vcmp.eq.s32.totalorder %v158_v12, %v386_v16 }
  0x65   :  { %vm166_vm9 = vmand %vm164_vm7, %vm520_vm8 }
  0x66   :  { %v168_v30 = vsel %vm166_vm9, 1.0, %v459_v20 }
  0x6b   :  { %v161_v17 = vpop.permute.xlu2 %160 }
  0x6c   :  { %vm165_vm0 = vcmp.eq.s32.totalorder %v161_v17, %v386_v16 }
  0x6d   :  { %vm167_vm4 = vmand %vm165_vm0, %vm503_vm3 }
  0x6e   :  { %v169_v21 = vsel %vm167_vm4, 1.0, %v459_v20 }
  0xa3   :  { %v128_v23 = vpop.f32.mrf.mxu0 }
  0xa4   :  { %v133_v24 = vmul.f32 14.285714, %v128_v23 }
  0xa6   :  { %v152_v25 = vsel %vm149_vm1, %v133_v24, -1e+30  ;;  %v217_v52 = vmul.f32 %v168_v30, %v133_v24 }
  0xa7   :  { %172 = vmax.xlane.f32.xlu0 %v152_v25 }
  0xab   :  { %v130_v26 = vpop.f32.mrf.mxu0 }
  0xac   :  { %v134_v27 = vmul.f32 14.285714, %v130_v26  ;;  %v216_v26 = vld [vmem:[#allocation4 + $0x8] sm:$0xff] }
  0xae   :  { %v153_v28 = vsel %vm149_vm1, %v134_v27, -1e+30  ;;  %v218_v53 = vmul.f32 %v169_v21, %v134_v27 }
  0xaf   :  { %174 = vmax.xlane.f32.xlu0 %v153_v28 }
  0xb7   :  { %229 = vadd.xlane.f32.xlu0 %v168_v30 }
 0x11a   :  { %v173_v32 = vpop.xlane.xlu0 %172 }
 0x11b   :  { %v176_v33 = vmax.f32 %v170_v31, %v173_v32 }
 0x11d   :  { %v198_v34 = vsub.f32 %v170_v31, %v176_v33  ;;  %237 = vst.msk [vmem:[#allocation2] sm:$0xff] %vm38_vm5, %v176_v33  ;;  %180 = vperm.xlu1 %383, %v176_v33  }
 0x11f   :  { %v200_v57 = vmul.f32 1.442695, %v198_v34 }
 0x122   :  { %v175_v36 = vpop.xlane.xlu0 %174 }
 0x123   :  { %v177_v37 = vmax.f32 %v171_v35, %v175_v36 }
 0x125   :  { %v199_v38 = vsub.f32 %v171_v35, %v177_v37  ;;  %238 = vst.msk [vmem:[#allocation2 + $0x8] sm:$0xff] %vm38_vm5, %v177_v37  ;;  %185 = vperm.xlu1 %383, %v177_v37  }
 0x127   :  { %v202_v58 = vmul.f32 1.442695, %v199_v38 }
 0x12a   :  { %v230_v42 = vpop.xlane.xlu0 %229 }
 0x12b   :  { %v233_v44 = vadd.f32 %v230_v42, %v227_v43 }
 0x12c   :  { %v259_v42 = vld [vmem:[#allocation2 + $0x8] sm:$0xff] }
 0x12d   :  { %235 = vst.msk [vmem:[#allocation5] sm:$0xff] %vm38_vm5, %v233_v44 }
 0x134   :  { %v242_v59 = vld [vmem:[#allocation5] sm:$0xff] }
 0x135   :  { %vm244_vm10 = vcmp.lt.f32.partialorder %v242_v59, 1e-06 }
 0x136   :  { %v246_v2 = vsel %vm244_vm10, 1.0, %v242_v59 }
 0x137   :  { %vm271_vm12 = vweird.f32 %v246_v2  ;;  %v277_v29 = vand.u32 2147483648, %v246_v2  ;;  %v275_v34 = vand.u32 2147483647, %v246_v2 }
 0x139   :  { %vm276_vm1 = vcmp.eq.f32.partialorder %v275_v34, 8.507059e+37 }
 0x14f   :  { %231 = vadd.xlane.f32.xlu1 %v169_v21 }
 0x18f   :  { %v181_v39 = vpop.permute.xlu1 %180 }
 0x190   :  { %v188_v40 = vsub.f32 %v133_v24, %v181_v39  ;;  %v258_v24 = vld [vmem:[#allocation2] sm:$0xff]  ;;  %v278_v39 = vor.u32 1.1754944e-38, %v277_v29 }
 0x192   :  { %v190_v41 = vmul.f32 1.442695, %v188_v40 }
 0x194   :  { %387 = vpow2.f32 %v190_v41 }
 0x197   :  { %v186_v45 = vpop.permute.xlu1 %185 }
 0x198   :  { %v189_v46 = vsub.f32 %v134_v27, %v186_v45 }
 0x19a   :  { %v388_v47 = vpop.eup %387  ;;  %v192_v48 = vmul.f32 1.442695, %v189_v46 }
 0x19b   :  { %v194_v49 = vsel %vm520_vm8, %v388_v47, 0.0 }
 0x19c   :  { %389 = vpow2.f32 %v192_v48  ;;  %206 = vadd.xlane.f32.xlu2 %v194_v49 }
 0x19d   :  { %391 = vpow2.f32 %v200_v57 }
 0x19e   :  { %393 = vpow2.f32 %v202_v58 }
 0x19f   :  { %395 = vrcp.f32 %v246_v2 }
 0x1a2   :  { %v390_v50 = vpop.eup %389 }
 0x1a3   :  { %v195_v51 = vsel %vm503_vm3, %v390_v50, 0.0  ;;  %v392_v60 = vpop.eup %391 }
 0x1a4   :  { %208 = vadd.xlane.f32.xlu0 %v195_v51  ;;  %v204_v63 = vmul.f32 %v392_v60, %v196_v61  ;;  %v394_v3 = vpop.eup %393 }
 0x1a5   :  { %v205_v6 = vmul.f32 %v394_v3, %v197_v4  ;;  %v396_v9 = vpop.eup %395 }
 0x1a6   :  { %v267_v13 = vmul.f32 %v396_v9, %v246_v2  ;;  %vm272_vm13 = vweird.f32 %v396_v9 }
 0x1a7   :  { %vm541_vm14 = vmor %vm271_vm12, %vm272_vm13 }
 0x1a8   :  { %v268_v18 = vsub.f32 1.0, %v267_v13 }
 0x1aa   :  { %v269_v25 = vmul.f32 %v396_v9, %v268_v18 }
 0x1ac   :  { %219 = vadd.xlane.f32.xlu0 %v217_v52  ;;  %v270_v33 = vadd.f32 %v396_v9, %v269_v25 }
 0x1ae   :  { %v274_v44 = vsel %vm541_vm14, %v396_v9, %v270_v33 }
 0x1af   :  { %v279_v48 = vsel %vm276_vm1, %v278_v39, %v274_v44 }
 0x1b4   :  { %221 = vadd.xlane.f32.xlu0 %v218_v53 }
 0x1c2   :  { %v232_v55 = vpop.xlane.xlu1 %231 }
 0x1c3   :  { %v234_v56 = vadd.f32 %v232_v55, %v228_v54 }
 0x1c5   :  { %236 = vst.msk [vmem:[#allocation5 + $0x8] sm:$0xff] %vm38_vm5, %v234_v56 }
 0x1cc   :  { %v534_v62 = vld [vmem:[#allocation5 + $0x8] sm:$0xff] }
 0x1cd   :  { %vm245_vm11 = vcmp.lt.f32.partialorder %v534_v62, 1e-06 }
 0x1ce   :  { %v247_v5 = vsel %vm245_vm11, 1.0, %v534_v62 }
 0x1cf   :  { %397 = vrcp.f32 %v247_v5  ;;  %vm286_vm15 = vweird.f32 %v247_v5  ;;  %v292_v41 = vand.u32 2147483648, %v247_v5  ;;  %v290_v45 = vand.u32 2147483647, %v247_v5 }
 0x1d1   :  { %v293_v49 = vor.u32 1.1754944e-38, %v292_v41  ;;  %vm291_vm3 = vcmp.eq.f32.partialorder %v290_v45, 8.507059e+37 }
 0x1d5   :  { %v398_v12 = vpop.eup %397 }
 0x1d6   :  { %v282_v16 = vmul.f32 %v398_v12, %v247_v5  ;;  %vm287_vm0 = vweird.f32 %v398_v12 }
 0x1d7   :  { %vm288_vm2 = vmor %vm286_vm15, %vm287_vm0 }
 0x1d8   :  { %v283_v23 = vsub.f32 1.0, %v282_v16 }
 0x1da   :  { %v284_v30 = vmul.f32 %v398_v12, %v283_v23 }
 0x1dc   :  { %v285_v40 = vadd.f32 %v398_v12, %v284_v30 }
 0x1de   :  { %v289_v51 = vsel %vm288_vm2, %v398_v12, %v285_v40 }
 0x1df   :  { %v294_v54 = vsel %vm291_vm3, %v293_v49, %v289_v51 }
 0x20f   :  { %v207_v0 = vpop.xlane.xlu2 %206 }
 0x210   :  { %v210_v1 = vadd.f32 %v207_v0, %v204_v63 }
 0x212   :  { %213 = vst.msk [vmem:[#allocation3] sm:$0xff] %vm38_vm5, %v210_v1 }
 0x217   :  { %v209_v7 = vpop.xlane.xlu0 %208 }
 0x218   :  { %v211_v8 = vadd.f32 %v209_v7, %v205_v6 }
 0x219   :  { %v248_v10 = vld [vmem:[#allocation3] sm:$0xff] }
 0x21a   :  { %214 = vst.msk [vmem:[#allocation3 + $0x8] sm:$0xff] %vm38_vm5, %v211_v8  ;;  %v250_v11 = vadd.f32 1e-06, %v248_v10 }
 0x21c   :  { %399 = vlog2.f32 %v250_v11 }
 0x21f   :  { %v220_v15 = vpop.xlane.xlu0 %219 }
 0x220   :  { %v223_v17 = vadd.f32 %v220_v15, %v215_v14 }
 0x221   :  { %v249_v19 = vld [vmem:[#allocation3 + $0x8] sm:$0xff] }
 0x222   :  { %v400_v20 = vpop.eup %399  ;;  %225 = vst.msk [vmem:[#allocation4] sm:$0xff] %vm38_vm5, %v223_v17  ;;  %v251_v21 = vadd.f32 1e-06, %v249_v19 }
 0x223   :  { %v253_v22 = vmul.f32 0.6931472, %v400_v20 }
 0x224   :  { %401 = vlog2.f32 %v251_v21 }
 0x225   :  { %v260_v27 = vadd.f32 %v258_v24, %v253_v22 }
 0x227   :  { %v222_v28 = vpop.xlane.xlu0 %221  ;;  %v262_v32 = vmul.f32 %v260_v27, %v242_v59 }
 0x228   :  { %v224_v31 = vadd.f32 %v222_v28, %v216_v26 }
 0x229   :  { %v256_v35 = vld [vmem:[#allocation4] sm:$0xff] }
 0x22a   :  { %v402_v37 = vpop.eup %401  ;;  %226 = vst.msk [vmem:[#allocation4 + $0x8] sm:$0xff] %vm38_vm5, %v224_v31  ;;  %v264_v43 = vsub.f32 %v256_v35, %v262_v32 }
 0x22b   :  { %v255_v38 = vmul.f32 0.6931472, %v402_v37 }
 0x22c   :  { %v280_v50 = vmul.f32 %v279_v48, %v264_v43 }
 0x22d   :  { %v261_v46 = vadd.f32 %v259_v42, %v255_v38 }
 0x22e   :  { %v296_v56 = vmul.f32 -1.0, %v280_v50 }
 0x22f   :  { %v263_v47 = vmul.f32 %v261_v46, %v534_v62 }
 0x230   :  { %v298_v58 = vsel %vm38_vm5, %v296_v56, 0.0 }
 0x231   :  { %v257_v52 = vld [vmem:[#allocation4 + $0x8] sm:$0xff] }
 0x232   :  { %v265_v53 = vsub.f32 %v257_v52, %v263_v47 }
 0x234   :  { %v295_v55 = vmul.f32 %v294_v54, %v265_v53 }
 0x236   :  { %v297_v57 = vmul.f32 -1.0, %v295_v55 }
 0x238   :  { %v299_v59 = vsel %vm38_vm5, %v297_v57, 0.0 }
 0x239   :  { %v300_v60 = vadd.f32 %v299_v59, %v298_v58 }
 0x23b   :  { %v301_v61 = vrot.slane %v300_v60, 4 }
 0x23d   :  { %v302_v63 = vadd.f32 %v301_v61, %v300_v60 }
 0x23f   :  { %v303_v0 = vrot.slane %v302_v63, 2 }
 0x241   :  { %v304_v62 = vadd.f32 %v303_v0, %v302_v63 }
 0x243   :  { %v305_v1 = vrot.slane %v304_v62, 1 }
 0x245   :  { %v306_v2 = vadd.f32 %v305_v1, %v304_v62 }
 0x247   :  { %v307_v3 = vmul.f32 0.0009765625, %v306_v2 }
 0x249   :  { %310 = vperm.xlu0 %385, %v307_v3  }
 0x2bb   :  { %v311_v4 = vpop.permute.xlu0 %310 }
 0x2bc   :  { %313 = vst [vmem:[#allocation9] sm:$0xff] %v311_v4 }
 0x2bd   :  { %324 = dma.vmem_to_hbm [thread:$0]  %s320_s3, 128, %s322_s30, [#allocation8]  }
 0x2be   :  { %453 = dma.done.wait [#allocation8], 128  }
 0x2bf   :  { %454 = vsyncadd [#allocation8], 4294967168 }
 0x2c0   :  { %329 = vsyncpa [#allocation7], 1 }
 0x2c1   :  { %330 = vsyncpa [#allocation8], 1 }

</bundles_post_ra>
